<compile_context>
chip_gen: v7x
topology: tpu7x:2x2x1
jax: 0.10.0
libtpu: 0.0.40
codegen_flags: <defaults>
</compile_context>

<pallas_src>
import jax
import jax.numpy as jnp
import numpy as np
from jax.experimental import pallas as pl
from jax.experimental.pallas import tpu as pltpu


# ----------------------------------------------------------------------------
# Per-branch math (shared by both kernel variants and the JAX reference).
#
#   x_new = (A_norm @ x_s) @ W_gcn + (M_mean @ x_o) @ W_sage_l
#           + x_s @ W_sage_r + b_cat           == cat([GCNConv, SAGEConv], dim=1)
#   score = <x_new, w_ss> + <A_sum @ x_new, w_sn> + b_s   (VPU mult + XLU reduce)
#   emb   = batch_onehot @ (x_new * tanh(score))          (global add pool)
# ----------------------------------------------------------------------------
def _branch_compute(x_s, x_o, adj_norm, adj_sum, bi_mean, batch_oh,
                    w0, w1, w2, b_cat, w_ss, w_sn, b_s,
                    mxu_dtype=jnp.bfloat16):
    f32 = jnp.float32

    # message aggregation: bf16 MXU inputs, f32 accumulation
    agg = jnp.dot(adj_norm, x_s, preferred_element_type=f32)     # [N, F]
    nbr = jnp.dot(bi_mean, x_o, preferred_element_type=f32)      # [N, F]

    # three full-width dots summed in f32 (no lane-axis concatenate / relayout)
    x_new = (jnp.dot(agg.astype(mxu_dtype), w0, preferred_element_type=f32)
             + jnp.dot(nbr.astype(mxu_dtype), w1, preferred_element_type=f32)
             + jnp.dot(x_s, w2, preferred_element_type=f32)
             + b_cat)                                            # [N, H] f32

    # SAG gate: GraphConv score = self term + add-aggregated neighbor term
    nbr_feat = jnp.dot(adj_sum, x_new.astype(mxu_dtype),
                       preferred_element_type=f32)
    score = jnp.sum(x_new * w_ss + nbr_feat * w_sn,
                    axis=1, keepdims=True) + b_s                 # [N, 1]
    x_att = x_new * jnp.tanh(score)

    # global add pool
    emb = jnp.dot(batch_oh, x_att.astype(mxu_dtype), preferred_element_type=f32)
    return x_new, emb


def _read_params(w_stack_ref, pvec_ref, b_s_ref):
    w0 = w_stack_ref[0]            # [F, H] bf16, cols [:H/2]  = GCN weight
    w1 = w_stack_ref[1]            # [F, H] bf16, cols [H/2:]  = SAGE lin_l
    w2 = w_stack_ref[2]            # [F, H] bf16, cols [H/2:]  = SAGE lin_r
    b_cat = pvec_ref[0:1, :]       # [1, H] f32
    w_ss = pvec_ref[1:2, :]        # [1, H] f32
    w_sn = pvec_ref[2:3, :]        # [1, H] f32
    b_s = b_s_ref[0]               # scalar f32 (SMEM)
    return w0, w1, w2, b_cat, w_ss, w_sn, b_s


def _cell_kernel_fused(x_elu_ref, adj_norm_ref, adj_sum_ref, bi_mean_ref,
                       batch_oh_ref, w_stack_ref, pvec_ref, b_s_ref,
                       x_new_ref, emb_ref):
    """Grid-less variant: both branches in one body (v5e / v6e default)."""
    w0, w1, w2, b_cat, w_ss, w_sn, b_s = _read_params(
        w_stack_ref, pvec_ref, b_s_ref)
    for b in range(2):             # static unroll: h-branch then t-branch
        x_new, emb = _branch_compute(
            x_elu_ref[b], x_elu_ref[1 - b],
            adj_norm_ref[b], adj_sum_ref[b], bi_mean_ref[b], batch_oh_ref[b],
            w0, w1, w2, b_cat, w_ss, w_sn, b_s)
        x_new_ref[b] = x_new.astype(x_new_ref.dtype)
        emb_ref[b] = emb.astype(emb_ref.dtype)


def _cell_kernel_branch(x_elu_ref, adj_norm_ref, adj_sum_ref, bi_mean_ref,
                        batch_oh_ref, w_stack_ref, pvec_ref, b_s_ref,
                        x_new_ref, emb_ref):
    """grid=(2,) variant: one branch per grid step (one per TensorCore on v7x)."""
    w0, w1, w2, b_cat, w_ss, w_sn, b_s = _read_params(
        w_stack_ref, pvec_ref, b_s_ref)
    b = pl.program_id(0)
    x_new, emb = _branch_compute(
        x_elu_ref[b], x_elu_ref[1 - b],          # x_elu is a resident const block
        adj_norm_ref[...], adj_sum_ref[...], bi_mean_ref[...], batch_oh_ref[...],
        w0, w1, w2, b_cat, w_ss, w_sn, b_s)
    x_new_ref[...] = x_new.astype(x_new_ref.dtype)
    emb_ref[...] = emb.astype(emb_ref.dtype)


# ----------------------------------------------------------------------------
# pallas_call wrapper
# ----------------------------------------------------------------------------
def run_cell(inp, fp, branch_parallel=False):
    _, n_pad, f = inp["x_elu"].shape
    g = inp["batch_oh"].shape[1]
    hidden = fp["w_stack"].shape[2]

    out_shape = (
        jax.ShapeDtypeStruct((2, n_pad, hidden), jnp.bfloat16),   # x_new (both)
        jax.ShapeDtypeStruct((2, g, hidden), jnp.bfloat16),       # graph emb
    )
    args = (inp["x_elu"], inp["adj_norm"], inp["adj_sum"], inp["bi_mean"],
            inp["batch_oh"], fp["w_stack"], fp["pvec"], fp["b_s"])
    smem = pl.BlockSpec(memory_space=pltpu.MemorySpace.SMEM)

    # TODO(synk): for large graphs the dense NxN operands must be row-tiled with
    # the contraction axis as a trailing "arbitrary" grid axis + f32 VMEM
    # accumulator; the dense-in-VMEM path only survives to N ~ 2-3K on
    # v5e/v6e (128 MiB physical VMEM) and ~1.6K on v7x (64 MiB).
    common = dict(vmem_limit_bytes=32 * 1024 * 1024)

    if not branch_parallel:
        # Single invocation, no grid: removes the ~0.35 us/step pipeline
        # overhead and halves DMA descriptors on single-TC chips (v5e / v6e).
        vmem = pl.BlockSpec(memory_space=pltpu.MemorySpace.VMEM)
        return pl.pallas_call(
            _cell_kernel_fused,
            in_specs=[vmem] * 7 + [smem],
            out_specs=(vmem, vmem),
            out_shape=out_shape,
            compiler_params=pltpu.CompilerParams(**common),
        )(*args)

    # v7x: grid=(2,) over branches, one TensorCore per branch.
    def per_branch(cols):
        return pl.BlockSpec((None, n_pad, cols), lambda b: (b, 0, 0))

    in_specs = [
        pl.BlockSpec((2, n_pad, f), lambda b: (0, 0, 0)),     # x_elu (resident)
        per_branch(n_pad),                                    # adj_norm
        per_branch(n_pad),                                    # adj_sum
        per_branch(n_pad),                                    # bi_mean
        pl.BlockSpec((None, g, n_pad), lambda b: (b, 0, 0)),  # batch one-hot
        pl.BlockSpec((3, f, hidden), lambda b: (0, 0, 0)),    # W stack (resident)
        pl.BlockSpec((3, hidden), lambda b: (0, 0)),          # b_cat / w_ss / w_sn
        smem,                                                 # b_s scalar
    ]
    out_specs = (
        pl.BlockSpec((None, n_pad, hidden), lambda b: (b, 0, 0)),
        pl.BlockSpec((None, g, hidden), lambda b: (b, 0, 0)),
    )
    return pl.pallas_call(
        _cell_kernel_branch,
        grid=(2,),
        in_specs=in_specs,
        out_specs=out_specs,
        out_shape=out_shape,
        compiler_params=pltpu.CompilerParams(
            dimension_semantics=("parallel",), **common),
    )(*args)


def _default_branch_parallel():
    """grid=(2,) 'parallel' only pays off with 2 TensorCores per chip (v7x)."""
    try:
        kind = jax.devices()[0].device_kind.lower()
    except Exception:
        return False
    return "v7" in kind


# ----------------------------------------------------------------------------
# Plain-JAX glue: elu once per feature matrix, densify graph structure, pad,
# stack both branches, cast MXU operands.  In a multi-layer model the
# adjacency scatters should be computed once per batch, not once per cell.
# ----------------------------------------------------------------------------
def _elu(x):
    return jnp.where(x > 0, x, jnp.exp(jnp.minimum(x, 0.0)) - 1.0)


def gcn_norm_adj(edge_index, n):
    """A_norm[dst, src] = d^{-1/2}[dst] * d^{-1/2}[src], d = in-degree(A)+1.
    Matches PyG gcn_norm for flow='source_to_target' with add_self_loops."""
    a = jnp.zeros((n, n), jnp.float32)
    a = a.at[edge_index[1], edge_index[0]].add(1.0)
    a = a + jnp.eye(n, dtype=jnp.float32)
    deg = a.sum(axis=1)
    dinv = jnp.where(deg > 0, 1.0 / jnp.sqrt(deg), 0.0)
    return a * dinv[:, None] * dinv[None, :]


def sum_adj(edge_index, n):
    a = jnp.zeros((n, n), jnp.float32)
    return a.at[edge_index[1], edge_index[0]].add(1.0)


def bipartite_mean_adj(src_idx, dst_idx, n_dst, n_src):
    a = jnp.zeros((n_dst, n_src), jnp.float32)
    a = a.at[dst_idx, src_idx].add(1.0)
    deg = a.sum(axis=1, keepdims=True)
    return a * jnp.where(deg > 0, 1.0 / deg, 0.0)


def batch_onehot(batch, num_graphs):
    return (batch[None, :] == jnp.arange(num_graphs)[:, None]).astype(jnp.float32)


def _pad_to(a, rows, cols):
    return jnp.pad(a, ((0, rows - a.shape[0]), (0, cols - a.shape[1])))


def prepare_inputs(h_x, h_edge_index, h_batch,
                   t_x, t_edge_index, t_batch,
                   b_edge_index, num_graphs, operand_dtype=jnp.bfloat16):
    nh, f = h_x.shape
    nt = t_x.shape[0]
    # 16-row multiple (bf16 packs 2 rows / sublane).  For big graphs prefer
    # padding toward the MXU tile instead (128 on v5e, 256 on v6e/v7x).
    n_pad = -(-max(nh, nt) // 16) * 16

    x_elu = jnp.stack([_pad_to(_elu(h_x), n_pad, f),
                       _pad_to(_elu(t_x), n_pad, f)])
    adj_norm = jnp.stack(
        [_pad_to(gcn_norm_adj(h_edge_index, nh), n_pad, n_pad),
         _pad_to(gcn_norm_adj(t_edge_index, nt), n_pad, n_pad)])
    adj_sum = jnp.stack(
        [_pad_to(sum_adj(h_edge_index, nh), n_pad, n_pad),
         _pad_to(sum_adj(t_edge_index, nt), n_pad, n_pad)])
    # b_edge_index: row 0 = h node idx, row 1 = t node idx
    m_th = bipartite_mean_adj(b_edge_index[1], b_edge_index[0], nh, nt)  # h <- t
    m_ht = bipartite_mean_adj(b_edge_index[0], b_edge_index[1], nt, nh)  # t <- h
    bi_mean = jnp.stack([_pad_to(m_th, n_pad, n_pad),
                         _pad_to(m_ht, n_pad, n_pad)])
    batch_oh = jnp.stack(
        [_pad_to(batch_onehot(h_batch, num_graphs), num_graphs, n_pad),
         _pad_to(batch_onehot(t_batch, num_graphs), num_graphs, n_pad)])

    return dict(x_elu=x_elu.astype(operand_dtype),
                adj_norm=adj_norm.astype(operand_dtype),
                adj_sum=adj_sum.astype(operand_dtype),
                bi_mean=bi_mean.astype(operand_dtype),
                batch_oh=batch_oh.astype(operand_dtype),
                nh=nh, nt=nt, n_pad=n_pad)


def fuse_params(params, in_features, hidden_dim, operand_dtype=jnp.bfloat16):
    """Three full-width [F, H] weights (zeroed column halves) so
    x_new = agg@W0 + nbr@W1 + x_s@W2 equals cat([GCN rep, SAGE rep], dim=1);
    small vectors consolidated into one (3, H) array + one SMEM scalar."""
    f, hd2 = in_features, hidden_dim // 2
    zeros = jnp.zeros((f, hidden_dim), jnp.float32)
    w0 = zeros.at[:, :hd2].set(params["w_conv"])     # GCN weight on agg
    w1 = zeros.at[:, hd2:].set(params["w_l"])        # SAGE lin_l on nbr-mean
    w2 = zeros.at[:, hd2:].set(params["w_r"])        # SAGE lin_r on self
    w_stack = jnp.stack([w0, w1, w2]).astype(operand_dtype)          # (3, F, H)
    b_cat = jnp.concatenate([params["b_conv"], params["b_bi"]], axis=1)
    pvec = jnp.concatenate(
        [b_cat, params["w_ss"].T, params["w_sn"].T], axis=0)         # (3, H) f32
    b_s = params["b_s"].reshape((1,)).astype(jnp.float32)            # SMEM scalar
    return dict(w_stack=w_stack, pvec=pvec, b_s=b_s)


def autoddi_cell_forward(h_x, h_edge_index, h_batch,
                         t_x, t_edge_index, t_batch,
                         b_edge_index, num_graphs, params,
                         branch_parallel=None):
    """Mirrors AutoDDI_Cell.forward; returns (h_x_new, t_x_new, h_emb, t_emb)."""
    if branch_parallel is None:
        branch_parallel = _default_branch_parallel()
    inp = prepare_inputs(h_x, h_edge_index, h_batch,
                         t_x, t_edge_index, t_batch,
                         b_edge_index, num_graphs)
    fp = fuse_params(params, h_x.shape[1], 2 * params["w_conv"].shape[1])
    x_new, emb = run_cell(inp, fp, branch_parallel=branch_parallel)
    return (x_new[0, :inp["nh"]], x_new[1, :inp["nt"]], emb[0], emb[1])


# ----------------------------------------------------------------------------
# Pure-JAX reference (same _branch_compute math) for checks.
# ----------------------------------------------------------------------------
def _cell_ref(inp, fp, mxu_dtype=jnp.bfloat16):
    w0, w1, w2 = fp["w_stack"][0], fp["w_stack"][1], fp["w_stack"][2]
    b_cat, w_ss, w_sn = fp["pvec"][0:1], fp["pvec"][1:2], fp["pvec"][2:3]
    b_s = fp["b_s"][0]
    xs, es = [], []
    for b in range(2):
        x_new, emb = _branch_compute(
            inp["x_elu"][b], inp["x_elu"][1 - b],
            inp["adj_norm"][b], inp["adj_sum"][b], inp["bi_mean"][b],
            inp["batch_oh"][b], w0, w1, w2, b_cat, w_ss, w_sn, b_s,
            mxu_dtype=mxu_dtype)
        xs.append(x_new)
        es.append(emb)
    return jnp.stack(xs), jnp.stack(es)


# ----------------------------------------------------------------------------
if __name__ == "__main__":
    in_features = 8
    hidden_dim = 32            # multiples of 128 would make stores lane-dense
    hd2 = hidden_dim // 2
    num_graphs = 2
    nh, nt = 12, 10            # h / t graph node counts
    n_eh, n_et, n_eb = 24, 20, 16

    key = jax.random.PRNGKey(0)
    keys = jax.random.split(key, 11)

    h_x = jax.random.normal(keys[0], (nh, in_features), jnp.float32)
    t_x = jax.random.normal(keys[1], (nt, in_features), jnp.float32)

    # graph structure (edge_index layout: [2, E], row0=src, row1=dst)
    h_edge_index = jax.random.randint(keys[2], (2, n_eh), 0, nh)
    t_edge_index = jax.random.randint(keys[3], (2, n_et), 0, nt)
    b_edge_index = jnp.stack([
        jax.random.randint(keys[4], (n_eb,), 0, nh),
        jax.random.randint(keys[5], (n_eb,), 0, nt),
    ])
    h_batch = jnp.concatenate([jnp.zeros(nh // 2, jnp.int32),
                               jnp.ones(nh - nh // 2, jnp.int32)])
    t_batch = jnp.concatenate([jnp.zeros(nt // 2, jnp.int32),
                               jnp.ones(nt - nt // 2, jnp.int32)])

    def w(k, shape):
        return jax.random.normal(k, shape, jnp.float32) * 0.1

    params = {
        "w_conv": w(keys[6], (in_features, hd2)),        # GCNConv weight
        "b_conv": jnp.zeros((1, hd2), jnp.float32),
        "w_l": w(keys[7], (in_features, hd2)),           # SAGE lin_l (neighbors)
        "w_r": w(keys[8], (in_features, hd2)),           # SAGE lin_r (self)
        "b_bi": jnp.zeros((1, hd2), jnp.float32),
        "w_ss": w(keys[9], (hidden_dim, 1)),             # SAG score: self term
        "w_sn": w(keys[10], (hidden_dim, 1)),            # SAG score: neighbor term
        "b_s": jnp.zeros((1, 1), jnp.float32),
    }
    # TODO(synk): other architecture choices (GAT conv, TopK/SAG pooling with
    # ratio < 1, i.e. dynamic node dropping) need data-dependent shapes and are
    # not mapped here.

    inp = prepare_inputs(h_x, h_edge_index, h_batch, t_x, t_edge_index, t_batch,
                         b_edge_index, num_graphs)
    fp = fuse_params(params, in_features, hidden_dim)
    x_ref, e_ref = _cell_ref(inp, fp)          # matched-precision reference

    # Exercise BOTH launch modes regardless of chip: grid-less fused body
    # (v5e/v6e default) and branch-per-TensorCore grid (v7x default).
    for branch_parallel in (False, True):
        x_new, emb = jax.block_until_ready(
            run_cell(inp, fp, branch_parallel=branch_parallel))
        np.testing.assert_allclose(np.asarray(x_new.astype(jnp.float32)),
                                   np.asarray(x_ref), rtol=2e-2, atol=5e-3)
        np.testing.assert_allclose(np.asarray(emb.astype(jnp.float32)),
                                   np.asarray(e_ref), rtol=2e-2, atol=5e-3)

    # Coarse sanity bound on the bf16-operand deviation from full-f32 math
    # (addresses the review's correctness concern: the drift vs the f32 module
    # is now measured, not just bf16-vs-bf16).
    inp32 = prepare_inputs(h_x, h_edge_index, h_batch, t_x, t_edge_index,
                           t_batch, b_edge_index, num_graphs,
                           operand_dtype=jnp.float32)
    fp32 = fuse_params(params, in_features, hidden_dim,
                       operand_dtype=jnp.float32)
    with jax.default_matmul_precision("highest"):
        x_ref32, e_ref32 = _cell_ref(inp32, fp32, mxu_dtype=jnp.float32)
    x_new, emb = jax.block_until_ready(run_cell(inp, fp))
    np.testing.assert_allclose(np.asarray(x_new.astype(jnp.float32)),
                               np.asarray(x_ref32), rtol=1e-1, atol=2e-1)
    np.testing.assert_allclose(np.asarray(emb.astype(jnp.float32)),
                               np.asarray(e_ref32), rtol=1e-1, atol=2e-1)

    # Public wrapper (auto-selects launch mode from the device kind) returns
    # the unpadded per-branch outputs, like the PyTorch module.
    h_x_new, t_x_new, h_emb, t_emb = jax.block_until_ready(
        autoddi_cell_forward(h_x, h_edge_index, h_batch, t_x, t_edge_index,
                             t_batch, b_edge_index, num_graphs, params))
    np.testing.assert_allclose(np.asarray(h_x_new.astype(jnp.float32)),
                               np.asarray(x_ref[0, :nh]), rtol=2e-2, atol=5e-3)
    np.testing.assert_allclose(np.asarray(t_x_new.astype(jnp.float32)),
                               np.asarray(x_ref[1, :nt]), rtol=2e-2, atol=5e-3)
    np.testing.assert_allclose(np.asarray(h_emb.astype(jnp.float32)),
                               np.asarray(e_ref[0]), rtol=2e-2, atol=5e-3)
    np.testing.assert_allclose(np.asarray(t_emb.astype(jnp.float32)),
                               np.asarray(e_ref[1]), rtol=2e-2, atol=5e-3)

    print("KERNEL_OK")
</pallas_src>

<mosaic_0001>
module attributes {stable_mosaic.version = 11 : i64} {
  func.func @_cell_kernel_fused(%arg0: memref<2x16x8xbf16, #tpu.memory_space<vmem>>, %arg1: memref<2x16x16xbf16, #tpu.memory_space<vmem>>, %arg2: memref<2x16x16xbf16, #tpu.memory_space<vmem>>, %arg3: memref<2x16x16xbf16, #tpu.memory_space<vmem>>, %arg4: memref<2x2x16xbf16, #tpu.memory_space<vmem>>, %arg5: memref<3x8x32xbf16, #tpu.memory_space<vmem>>, %arg6: memref<3x32xf32, #tpu.memory_space<vmem>>, %arg7: memref<1xf32, #tpu.memory_space<smem>>, %arg8: memref<2x16x32xbf16, #tpu.memory_space<vmem>>, %arg9: memref<2x2x32xbf16, #tpu.memory_space<vmem>>) attributes {dimension_semantics = [], scalar_prefetch = 0 : i64, scratch_operands = 0 : i64, tpu.core_type = #tpu.core_type<tc>} {
    %c0 = arith.constant 0 : index
    %c0_0 = arith.constant 0 : index
    %c0_1 = arith.constant 0 : index
    %0 = vector.load %arg5[%c0, %c0_0, %c0_1] : memref<3x8x32xbf16, #tpu.memory_space<vmem>>, vector<1x8x32xbf16>
    %1 = vector.shape_cast %0 : vector<1x8x32xbf16> to vector<8x32xbf16>
    %c1 = arith.constant 1 : index
    %c0_2 = arith.constant 0 : index
    %c0_3 = arith.constant 0 : index
    %2 = vector.load %arg5[%c1, %c0_2, %c0_3] : memref<3x8x32xbf16, #tpu.memory_space<vmem>>, vector<1x8x32xbf16>
    %3 = vector.shape_cast %2 : vector<1x8x32xbf16> to vector<8x32xbf16>
    %c2 = arith.constant 2 : index
    %c0_4 = arith.constant 0 : index
    %c0_5 = arith.constant 0 : index
    %4 = vector.load %arg5[%c2, %c0_4, %c0_5] : memref<3x8x32xbf16, #tpu.memory_space<vmem>>, vector<1x8x32xbf16>
    %5 = vector.shape_cast %4 : vector<1x8x32xbf16> to vector<8x32xbf16>
    %c0_6 = arith.constant 0 : index
    %c0_7 = arith.constant 0 : index
    %6 = vector.load %arg6[%c0_6, %c0_7] : memref<3x32xf32, #tpu.memory_space<vmem>>, vector<1x32xf32>
    %c1_8 = arith.constant 1 : index
    %c0_9 = arith.constant 0 : index
    %7 = vector.load %arg6[%c1_8, %c0_9] : memref<3x32xf32, #tpu.memory_space<vmem>>, vector<1x32xf32>
    %c2_10 = arith.constant 2 : index
    %c0_11 = arith.constant 0 : index
    %8 = vector.load %arg6[%c2_10, %c0_11] : memref<3x32xf32, #tpu.memory_space<vmem>>, vector<1x32xf32>
    %c0_12 = arith.constant 0 : index
    %9 = memref.load %arg7[%c0_12] : memref<1xf32, #tpu.memory_space<smem>>
    %c0_13 = arith.constant 0 : index
    %c0_14 = arith.constant 0 : index
    %c0_15 = arith.constant 0 : index
    %10 = vector.load %arg0[%c0_13, %c0_14, %c0_15] : memref<2x16x8xbf16, #tpu.memory_space<vmem>>, vector<1x16x8xbf16>
    %11 = vector.shape_cast %10 : vector<1x16x8xbf16> to vector<16x8xbf16>
    %c1_16 = arith.constant 1 : index
    %c0_17 = arith.constant 0 : index
    %c0_18 = arith.constant 0 : index
    %12 = vector.load %arg0[%c1_16, %c0_17, %c0_18] : memref<2x16x8xbf16, #tpu.memory_space<vmem>>, vector<1x16x8xbf16>
    %13 = vector.shape_cast %12 : vector<1x16x8xbf16> to vector<16x8xbf16>
    %c0_19 = arith.constant 0 : index
    %c0_20 = arith.constant 0 : index
    %c0_21 = arith.constant 0 : index
    %14 = vector.load %arg1[%c0_19, %c0_20, %c0_21] : memref<2x16x16xbf16, #tpu.memory_space<vmem>>, vector<1x16x16xbf16>
    %15 = vector.shape_cast %14 : vector<1x16x16xbf16> to vector<16x16xbf16>
    %c0_22 = arith.constant 0 : index
    %c0_23 = arith.constant 0 : index
    %c0_24 = arith.constant 0 : index
    %16 = vector.load %arg2[%c0_22, %c0_23, %c0_24] : memref<2x16x16xbf16, #tpu.memory_space<vmem>>, vector<1x16x16xbf16>
    %17 = vector.shape_cast %16 : vector<1x16x16xbf16> to vector<16x16xbf16>
    %c0_25 = arith.constant 0 : index
    %c0_26 = arith.constant 0 : index
    %c0_27 = arith.constant 0 : index
    %18 = vector.load %arg3[%c0_25, %c0_26, %c0_27] : memref<2x16x16xbf16, #tpu.memory_space<vmem>>, vector<1x16x16xbf16>
    %19 = vector.shape_cast %18 : vector<1x16x16xbf16> to vector<16x16xbf16>
    %c0_28 = arith.constant 0 : index
    %c0_29 = arith.constant 0 : index
    %c0_30 = arith.constant 0 : index
    %20 = vector.load %arg4[%c0_28, %c0_29, %c0_30] : memref<2x2x16xbf16, #tpu.memory_space<vmem>>, vector<1x2x16xbf16>
    %21 = vector.shape_cast %20 : vector<1x2x16xbf16> to vector<2x16xbf16>
    %cst = arith.constant dense<0.000000e+00> : vector<16x8xf32>
    %22 = tpu.matmul %15, %11, %cst {dimension_numbers = #tpu.dot_dimension_numbers<[1], [0], [0], [1], [0, 0, 1, 1], [], []>} : vector<16x16xbf16>, vector<16x8xbf16>, vector<16x8xf32> -> vector<16x8xf32>
    %cst_31 = arith.constant dense<0.000000e+00> : vector<16x8xf32>
    %23 = tpu.matmul %19, %13, %cst_31 {dimension_numbers = #tpu.dot_dimension_numbers<[1], [0], [0], [1], [0, 0, 1, 1], [], []>} : vector<16x16xbf16>, vector<16x8xbf16>, vector<16x8xf32> -> vector<16x8xf32>
    %24 = arith.truncf %22 : vector<16x8xf32> to vector<16x8xbf16>
    %cst_32 = arith.constant dense<0.000000e+00> : vector<16x32xf32>
    %25 = tpu.matmul %24, %1, %cst_32 {dimension_numbers = #tpu.dot_dimension_numbers<[1], [0], [0], [1], [0, 0, 1, 1], [], []>} : vector<16x8xbf16>, vector<8x32xbf16>, vector<16x32xf32> -> vector<16x32xf32>
    %26 = arith.truncf %23 : vector<16x8xf32> to vector<16x8xbf16>
    %cst_33 = arith.constant dense<0.000000e+00> : vector<16x32xf32>
    %27 = tpu.matmul %26, %3, %cst_33 {dimension_numbers = #tpu.dot_dimension_numbers<[1], [0], [0], [1], [0, 0, 1, 1], [], []>} : vector<16x8xbf16>, vector<8x32xbf16>, vector<16x32xf32> -> vector<16x32xf32>
    %28 = arith.addf %25, %27 : vector<16x32xf32>
    %cst_34 = arith.constant dense<0.000000e+00> : vector<16x32xf32>
    %29 = tpu.matmul %11, %5, %cst_34 {dimension_numbers = #tpu.dot_dimension_numbers<[1], [0], [0], [1], [0, 0, 1, 1], [], []>} : vector<16x8xbf16>, vector<8x32xbf16>, vector<16x32xf32> -> vector<16x32xf32>
    %30 = arith.addf %28, %29 : vector<16x32xf32>
    %31 = vector.broadcast %6 : vector<1x32xf32> to vector<16x32xf32>
    %32 = arith.addf %30, %31 : vector<16x32xf32>
    %33 = arith.truncf %32 : vector<16x32xf32> to vector<16x32xbf16>
    %cst_35 = arith.constant dense<0.000000e+00> : vector<16x32xf32>
    %34 = tpu.matmul %17, %33, %cst_35 {dimension_numbers = #tpu.dot_dimension_numbers<[1], [0], [0], [1], [0, 0, 1, 1], [], []>} : vector<16x16xbf16>, vector<16x32xbf16>, vector<16x32xf32> -> vector<16x32xf32>
    %35 = vector.broadcast %7 : vector<1x32xf32> to vector<16x32xf32>
    %36 = arith.mulf %32, %35 : vector<16x32xf32>
    %37 = vector.broadcast %8 : vector<1x32xf32> to vector<16x32xf32>
    %38 = arith.mulf %34, %37 : vector<16x32xf32>
    %39 = arith.addf %36, %38 : vector<16x32xf32>
    %cst_36 = arith.constant dense<0.000000e+00> : vector<16xf32>
    %40 = vector.multi_reduction <add>, %39, %cst_36 [1] : vector<16x32xf32> to vector<16xf32>
    %41 = vector.shape_cast %40 : vector<16xf32> to vector<16x1xf32>
    %42 = vector.broadcast %9 : f32 to vector<16x1xf32>
    %43 = arith.addf %41, %42 : vector<16x1xf32>
    %44 = math.tanh %43 : vector<16x1xf32>
    %45 = vector.broadcast %44 : vector<16x1xf32> to vector<16x32xf32>
    %46 = arith.mulf %32, %45 : vector<16x32xf32>
    %47 = arith.truncf %46 : vector<16x32xf32> to vector<16x32xbf16>
    %cst_37 = arith.constant dense<0.000000e+00> : vector<2x32xf32>
    %48 = tpu.matmul %21, %47, %cst_37 {dimension_numbers = #tpu.dot_dimension_numbers<[1], [0], [0], [1], [0, 0, 1, 1], [], []>} : vector<2x16xbf16>, vector<16x32xbf16>, vector<2x32xf32> -> vector<2x32xf32>
    %49 = arith.truncf %32 : vector<16x32xf32> to vector<16x32xbf16>
    %c0_38 = arith.constant 0 : index
    %c0_39 = arith.constant 0 : index
    %c0_40 = arith.constant 0 : index
    %50 = vector.load %arg8[%c0_38, %c0_39, %c0_40] : memref<2x16x32xbf16, #tpu.memory_space<vmem>>, vector<1x16x32xbf16>
    %51 = vector.shape_cast %50 : vector<1x16x32xbf16> to vector<16x32xbf16>
    %52 = vector.shape_cast %49 : vector<16x32xbf16> to vector<1x16x32xbf16>
    tpu.vector_store %arg8[%c0_38, %c0_39, %c0_40], %52 {strides = array<i32>} : memref<2x16x32xbf16, #tpu.memory_space<vmem>>, vector<1x16x32xbf16>,
    %53 = arith.truncf %48 : vector<2x32xf32> to vector<2x32xbf16>
    %c0_41 = arith.constant 0 : index
    %c0_42 = arith.constant 0 : index
    %c0_43 = arith.constant 0 : index
    %54 = vector.load %arg9[%c0_41, %c0_42, %c0_43] : memref<2x2x32xbf16, #tpu.memory_space<vmem>>, vector<1x2x32xbf16>
    %55 = vector.shape_cast %54 : vector<1x2x32xbf16> to vector<2x32xbf16>
    %56 = vector.shape_cast %53 : vector<2x32xbf16> to vector<1x2x32xbf16>
    tpu.vector_store %arg9[%c0_41, %c0_42, %c0_43], %56 {strides = array<i32>} : memref<2x2x32xbf16, #tpu.memory_space<vmem>>, vector<1x2x32xbf16>,
    %c1_44 = arith.constant 1 : index
    %c0_45 = arith.constant 0 : index
    %c0_46 = arith.constant 0 : index
    %57 = vector.load %arg0[%c1_44, %c0_45, %c0_46] : memref<2x16x8xbf16, #tpu.memory_space<vmem>>, vector<1x16x8xbf16>
    %58 = vector.shape_cast %57 : vector<1x16x8xbf16> to vector<16x8xbf16>
    %c0_47 = arith.constant 0 : index
    %c0_48 = arith.constant 0 : index
    %c0_49 = arith.constant 0 : index
    %59 = vector.load %arg0[%c0_47, %c0_48, %c0_49] : memref<2x16x8xbf16, #tpu.memory_space<vmem>>, vector<1x16x8xbf16>
    %60 = vector.shape_cast %59 : vector<1x16x8xbf16> to vector<16x8xbf16>
    %c1_50 = arith.constant 1 : index
    %c0_51 = arith.constant 0 : index
    %c0_52 = arith.constant 0 : index
    %61 = vector.load %arg1[%c1_50, %c0_51, %c0_52] : memref<2x16x16xbf16, #tpu.memory_space<vmem>>, vector<1x16x16xbf16>
    %62 = vector.shape_cast %61 : vector<1x16x16xbf16> to vector<16x16xbf16>
    %c1_53 = arith.constant 1 : index
    %c0_54 = arith.constant 0 : index
    %c0_55 = arith.constant 0 : index
    %63 = vector.load %arg2[%c1_53, %c0_54, %c0_55] : memref<2x16x16xbf16, #tpu.memory_space<vmem>>, vector<1x16x16xbf16>
    %64 = vector.shape_cast %63 : vector<1x16x16xbf16> to vector<16x16xbf16>
    %c1_56 = arith.constant 1 : index
    %c0_57 = arith.constant 0 : index
    %c0_58 = arith.constant 0 : index
    %65 = vector.load %arg3[%c1_56, %c0_57, %c0_58] : memref<2x16x16xbf16, #tpu.memory_space<vmem>>, vector<1x16x16xbf16>
    %66 = vector.shape_cast %65 : vector<1x16x16xbf16> to vector<16x16xbf16>
    %c1_59 = arith.constant 1 : index
    %c0_60 = arith.constant 0 : index
    %c0_61 = arith.constant 0 : index
    %67 = vector.load %arg4[%c1_59, %c0_60, %c0_61] : memref<2x2x16xbf16, #tpu.memory_space<vmem>>, vector<1x2x16xbf16>
    %68 = vector.shape_cast %67 : vector<1x2x16xbf16> to vector<2x16xbf16>
    %cst_62 = arith.constant dense<0.000000e+00> : vector<16x8xf32>
    %69 = tpu.matmul %62, %58, %cst_62 {dimension_numbers = #tpu.dot_dimension_numbers<[1], [0], [0], [1], [0, 0, 1, 1], [], []>} : vector<16x16xbf16>, vector<16x8xbf16>, vector<16x8xf32> -> vector<16x8xf32>
    %cst_63 = arith.constant dense<0.000000e+00> : vector<16x8xf32>
    %70 = tpu.matmul %66, %60, %cst_63 {dimension_numbers = #tpu.dot_dimension_numbers<[1], [0], [0], [1], [0, 0, 1, 1], [], []>} : vector<16x16xbf16>, vector<16x8xbf16>, vector<16x8xf32> -> vector<16x8xf32>
    %71 = arith.truncf %69 : vector<16x8xf32> to vector<16x8xbf16>
    %cst_64 = arith.constant dense<0.000000e+00> : vector<16x32xf32>
    %72 = tpu.matmul %71, %1, %cst_64 {dimension_numbers = #tpu.dot_dimension_numbers<[1], [0], [0], [1], [0, 0, 1, 1], [], []>} : vector<16x8xbf16>, vector<8x32xbf16>, vector<16x32xf32> -> vector<16x32xf32>
    %73 = arith.truncf %70 : vector<16x8xf32> to vector<16x8xbf16>
    %cst_65 = arith.constant dense<0.000000e+00> : vector<16x32xf32>
    %74 = tpu.matmul %73, %3, %cst_65 {dimension_numbers = #tpu.dot_dimension_numbers<[1], [0], [0], [1], [0, 0, 1, 1], [], []>} : vector<16x8xbf16>, vector<8x32xbf16>, vector<16x32xf32> -> vector<16x32xf32>
    %75 = arith.addf %72, %74 : vector<16x32xf32>
    %cst_66 = arith.constant dense<0.000000e+00> : vector<16x32xf32>
    %76 = tpu.matmul %58, %5, %cst_66 {dimension_numbers = #tpu.dot_dimension_numbers<[1], [0], [0], [1], [0, 0, 1, 1], [], []>} : vector<16x8xbf16>, vector<8x32xbf16>, vector<16x32xf32> -> vector<16x32xf32>
    %77 = arith.addf %75, %76 : vector<16x32xf32>
    %78 = vector.broadcast %6 : vector<1x32xf32> to vector<16x32xf32>
    %79 = arith.addf %77, %78 : vector<16x32xf32>
    %80 = arith.truncf %79 : vector<16x32xf32> to vector<16x32xbf16>
    %cst_67 = arith.constant dense<0.000000e+00> : vector<16x32xf32>
    %81 = tpu.matmul %64, %80, %cst_67 {dimension_numbers = #tpu.dot_dimension_numbers<[1], [0], [0], [1], [0, 0, 1, 1], [], []>} : vector<16x16xbf16>, vector<16x32xbf16>, vector<16x32xf32> -> vector<16x32xf32>
    %82 = vector.broadcast %7 : vector<1x32xf32> to vector<16x32xf32>
    %83 = arith.mulf %79, %82 : vector<16x32xf32>
    %84 = vector.broadcast %8 : vector<1x32xf32> to vector<16x32xf32>
    %85 = arith.mulf %81, %84 : vector<16x32xf32>
    %86 = arith.addf %83, %85 : vector<16x32xf32>
    %cst_68 = arith.constant dense<0.000000e+00> : vector<16xf32>
    %87 = vector.multi_reduction <add>, %86, %cst_68 [1] : vector<16x32xf32> to vector<16xf32>
    %88 = vector.shape_cast %87 : vector<16xf32> to vector<16x1xf32>
    %89 = vector.broadcast %9 : f32 to vector<16x1xf32>
    %90 = arith.addf %88, %89 : vector<16x1xf32>
    %91 = math.tanh %90 : vector<16x1xf32>
    %92 = vector.broadcast %91 : vector<16x1xf32> to vector<16x32xf32>
    %93 = arith.mulf %79, %92 : vector<16x32xf32>
    %94 = arith.truncf %93 : vector<16x32xf32> to vector<16x32xbf16>
    %cst_69 = arith.constant dense<0.000000e+00> : vector<2x32xf32>
    %95 = tpu.matmul %68, %94, %cst_69 {dimension_numbers = #tpu.dot_dimension_numbers<[1], [0], [0], [1], [0, 0, 1, 1], [], []>} : vector<2x16xbf16>, vector<16x32xbf16>, vector<2x32xf32> -> vector<2x32xf32>
    %96 = arith.truncf %79 : vector<16x32xf32> to vector<16x32xbf16>
    %c1_70 = arith.constant 1 : index
    %c0_71 = arith.constant 0 : index
    %c0_72 = arith.constant 0 : index
    %97 = vector.load %arg8[%c1_70, %c0_71, %c0_72] : memref<2x16x32xbf16, #tpu.memory_space<vmem>>, vector<1x16x32xbf16>
    %98 = vector.shape_cast %97 : vector<1x16x32xbf16> to vector<16x32xbf16>
    %99 = vector.shape_cast %96 : vector<16x32xbf16> to vector<1x16x32xbf16>
    tpu.vector_store %arg8[%c1_70, %c0_71, %c0_72], %99 {strides = array<i32>} : memref<2x16x32xbf16, #tpu.memory_space<vmem>>, vector<1x16x32xbf16>,
    %100 = arith.truncf %95 : vector<2x32xf32> to vector<2x32xbf16>
    %c1_73 = arith.constant 1 : index
    %c0_74 = arith.constant 0 : index
    %c0_75 = arith.constant 0 : index
    %101 = vector.load %arg9[%c1_73, %c0_74, %c0_75] : memref<2x2x32xbf16, #tpu.memory_space<vmem>>, vector<1x2x32xbf16>
    %102 = vector.shape_cast %101 : vector<1x2x32xbf16> to vector<2x32xbf16>
    %103 = vector.shape_cast %100 : vector<2x32xbf16> to vector<1x2x32xbf16>
    tpu.vector_store %arg9[%c1_73, %c0_74, %c0_75], %103 {strides = array<i32>} : memref<2x2x32xbf16, #tpu.memory_space<vmem>>, vector<1x2x32xbf16>,
    return
  }
}

</mosaic_0001>

<bundles_post_ra>
// kernel: tpu_custom_call.1
= control target key start
LH: loop header
LB: loop body
LE: loop exit
PB: predicated region body
PF: predicated region fallthrough
CT: control target
= control target key end

     0   :  { %16 = vsyncpa [#allocation4], 0  ;;  %s1404_s0 = inlined_call_operand.vmem [shape: bf16[2,16,8], index: 0, kind: input, shape index: {}]   ;;  %s1405_s1 = inlined_call_operand.vmem [shape: bf16[2,16,16], index: 1, kind: input, shape index: {}]   ;;  %s1406_s2 = inlined_call_operand.vmem [shape: bf16[2,16,16], index: 2, kind: input, shape index: {}]   ;;  %s1407_s3 = inlined_call_operand.hbm [shape: bf16[2,16,16], index: 3, kind: input, shape index: {}]   ;;  %s1408_s4 = inlined_call_operand.vmem [shape: bf16[2,2,16], index: 4, kind: input, shape index: {}]   ;;  %s1409_s5 = inlined_call_operand.vmem [shape: bf16[3,8,32], index: 5, kind: input, shape index: {}]   ;;  %s1410_s6 = inlined_call_operand.vmem [shape: f32[3,32], index: 6, kind: input, shape index: {}]   ;;  %s1411_s7 = inlined_call_operand.<no memory space> [shape: f32[1], index: 7, kind: input, shape index: {}]   ;;  %s1412_s8 = inlined_call_operand.hbm [shape: bf16[2,16,32], index: 8, kind: output, shape index: {0}]   ;;  %s1413_s9 = inlined_call_operand.hbm [shape: bf16[2,2,32], index: 9, kind: output, shape index: {1}]  }
   0x1   :  { %17 = vsyncpa [#allocation5], 0 }
   0x2   :  { %18 = vsyncpa [#allocation8], 0  ;;  %s1147_s30 = smov [#allocation3]   ;;  %s1075_s13 = scalar_lea.hbm %s1407_s3, 256 }
   0x3   :  { %s30_s10 = sshll.u32 %s1147_s30, 4  ;;  %p1076_p0 = scmp.ne.s32.totalorder %s1407_s3, %s1075_s13  ;;  %s31_s10 = int_to_ptr.vmem [resolvable:$true] %s30_s10 }
   0x4   :  { %p1079_p1 = scmp.lt.u32.totalorder %s1075_s13, %s1407_s3 }
   0x6   :  { %p1081_p2 = pnand %p1079_p1, %p1076_p0 }
   0x8   :  { %1084 = shalt.err (!%p1081_p2)
}
   0x9   :  { %s1085_s18 = scalar_lea.vmem %s31_s10, 256  ;;  %p1090_p4 = scmp.lt.s32.totalorder %s31_s10, %s31_s10 }
   0xa   :  { %p1086_p3 = scmp.ne.s32.totalorder %s31_s10, %s1085_s18  ;;  %p1091_p5 = scmp.lt.s32.totalorder %s1085_s18, %s1085_s18 }
   0xc   :  { %p1092_p6 = por %p1091_p5, %p1090_p4 }
   0xe   :  { %p1093_p7 = pnand %p1092_p6, %p1086_p3 }
  0x10   :  { %1096 = shalt.err (!%p1093_p7)
}
  0x11   :  { %s1148_s19 = smov 64   ;;  %s1149_s20 = smov 4  }
  0x12   :  { %36 = dma.hbm_to_vmem [thread:$0]  %s1407_s3, 256, %s31_s10, [#allocation4], %s1148_s19, %s1148_s19, %s1149_s20  }
  0x13   :  { %1141 = dma.done.wait [#allocation4], 256  }
  0x14   :  { %1142 = vsyncadd [#allocation4], 4294967040  ;;  %v1150_v0 = vmov 0.0   ;;  %vm1151_vm0 = vmmov 0   ;;  %v1057_v1 = vld [vmem:[%s1404_s0] sm:$0xff]   ;;  %v1058_v2 = vld [vmem:[%s1404_s0 + $0x8] sm:$0xff]   ;;  %v1324_v60 = vstv %s1411_s7 }
  0x15   :  { %964 = vmatprep.subr.bf16.mxu0 %v1150_v0  ;;  %970 = vmatprep.subr.bf16.mxu1 %v1150_v0  ;;  %v1059_v3 = vld [vmem:[%s1405_s1] sm:$0xff]   ;;  %vm81_vm1 = vcmask 130048   ;;  %vm187_vm2 = vcmask 1043456   ;;  %v891_v12 = vld [vmem:[%s1409_s5 + $0x8] sm:$0xf]  ;;  %vm183_vm3 = vcmask 64512  }
  0x16   :  { %966 = vmatprep.mubr.msk.bf16.mxu0 %vm1151_vm0, %v1150_v0  ;;  %972 = vmatprep.mubr.msk.bf16.mxu1 %vm1151_vm0, %v1150_v0  ;;  %v1060_v4 = vld [vmem:[#allocation3] sm:$0xff]   ;;  %v1264_v20 = vsel %vm187_vm2, %v891_v12, 0  ;;  %vm463_vm4 = vcmask 257024   ;;  %vm398_vm5 = vcmask 261120   ;;  %v1062_v58 = vld [vmem:[%s1404_s0 + $0x8] sm:$0xff]   ;;  %vm467_vm6 = vcmask 253952  }
  0x17   :  { %965 = vmatpush3.bf16.msra.mxu0 %v1057_v1  ;;  %971 = vmatpush3.bf16.msra.mxu1 %v1058_v2  ;;  %v890_v5 = vld [vmem:[%s1409_s5 + $0x4] sm:$0xf]  ;;  %v49_v6 = vld [vmem:[%s1409_s5] sm:$0xf]  ;;  %v1064_v59 = vld [vmem:[%s1405_s1 + $0x8] sm:$0xff]   ;;  %s1152_s30 = smov [#allocation6]  }
  0x18   :  { %976 = vmatprep.subr.bf16.mxu0 %v1150_v0  ;;  %982 = vmatprep.subr.bf16.mxu1 %v1150_v0  ;;  %v1251_v7 = vsel %vm187_vm2, %v890_v5, 0  ;;  %v1254_v8 = vsel %vm187_vm2, %v49_v6, 0  ;;  %v1280_v31 = vld [vmem:[%s1410_s6] ss:$0 sm:$0xff]  ;;  %v1296_v44 = vld [vmem:[%s1410_s6 + $0x2] ss:$0 sm:$0xff] }
  0x19   :  { %v1061_v43 = vld [vmem:[%s1406_s2] sm:$0xff]   ;;  %s862_s10 = sshll.u32 %s1152_s30, 4  ;;  %s863_s10 = int_to_ptr.vmem [resolvable:$true] %s862_s10 }
  0x1a   :  { %967 = vmatmul.mubr.msk.bf16.vlgmr.msra.gmra.mrb[0].mxu0 %vm81_vm1, %v1059_v3  ;;  %973 = vmatmul.mubr.msk.bf16.vlgmr.msra.gmra.mrb[0].mxu1 %vm81_vm1, %v1060_v4  ;;  %v1301_v45 = vld [vmem:[%s1410_s6 + $0x1] ss:$0 sm:$0xff]  ;;  %s1097_s11 = scalar_lea.vmem %s863_s10, 256  ;;  %p1102_p9 = scmp.lt.s32.totalorder %s863_s10, %s863_s10 }
  0x1b   :  { %978 = vmatprep.mubr.msk.bf16.mxu0 %vm1151_vm0, %v1150_v0  ;;  %984 = vmatprep.mubr.msk.bf16.mxu1 %vm1151_vm0, %v1150_v0  ;;  %p1098_p8 = scmp.ne.s32.totalorder %s863_s10, %s1097_s11  ;;  %p1103_p10 = scmp.lt.s32.totalorder %s1097_s11, %s1097_s11 }
  0x1c   :  { %977 = vmatpush3.bf16.msra.mxu0 %v1251_v7  ;;  %983 = vmatpush3.bf16.msra.mxu1 %v1254_v8 }
  0x1d   :  { %988 = vmatprep.subr.bf16.mxu0 %v1150_v0  ;;  %994 = vmatprep.subr.bf16.mxu1 %v1150_v0  ;;  %p1104_p11 = por %p1103_p10, %p1102_p9 }
  0x1f   :  { %p1105_p12 = pnand %p1104_p11, %p1098_p8 }
  0xed   :  { %v119_v9 = vpop.f32.mrb[0].mxu0  ;;  %v174_v10 = vpop.f32.mrb[0].mxu1 }
  0xee   :  { %v968_v11 = vpop.f32.mrb[1].mxu0  ;;  %v974_v13 = vpop.f32.mrb[1].mxu1 }
  0xef   :  { %v122_v14 = vpop.f32.mrb[2].mxu0  ;;  %v177_v16 = vpop.f32.mrb[2].mxu1 }
  0xf0   :  { %v181_v15 = vpack.c.bf16 %v122_v14, %v119_v9  ;;  %v969_v17 = vpop.f32.mrb[3].mxu0  ;;  %v182_v18 = vpack.c.bf16 %v177_v16, %v174_v10  ;;  %v975_v19 = vpop.f32.mrb[3].mxu1  ;;  %v1063_v9 = vld [vmem:[%s1404_s0] sm:$0xff]   ;;  %v1065_v10 = vld [vmem:[#allocation3 + $0x8] sm:$0xff]  }
  0xf2   :  { %985 = vmatmul.mubr.msk.bf16.vlgmr.msra.gmra.mrb[4].mxu1 %vm183_vm3, %v181_v15  ;;  %979 = vmatmul.mubr.msk.bf16.vlgmr.msra.gmra.mrb[4].mxu0 %vm183_vm3, %v182_v18 }
  0xf3   :  { %996 = vmatprep.mubr.msk.bf16.mxu1 %vm1151_vm0, %v1150_v0  ;;  %989 = vmatpush3.bf16.msra.mxu0 %v1264_v20 }
  0xf4   :  { %990 = vmatprep.mubr.msk.bf16.mxu0 %vm1151_vm0, %v1150_v0  ;;  %1000 = vmatprep.subr.bf16.mxu0 %v1150_v0 }
  0xfa   :  { %991 = vmatmul.mubr.msk.bf16.vlgmr.msra.gmra.mrb[8].mxu0 %vm183_vm3, %v1057_v1 }
  0xfb   :  { %1002 = vmatprep.mubr.msk.bf16.mxu0 %vm1151_vm0, %v1150_v0 }
 0x1c5   :  { %v272_v21 = vpop.f32.mrb[4].mxu1  ;;  %v225_v22 = vpop.f32.mrb[4].mxu0 }
 0x1c6   :  { %v986_v23 = vpop.f32.mrb[5].mxu1  ;;  %v273_v24 = vadd.f32 %v272_v21, %v225_v22  ;;  %v980_v25 = vpop.f32.mrb[5].mxu0 }
 0x1c7   :  { %v275_v26 = vpop.f32.mrb[6].mxu1  ;;  %v228_v27 = vpop.f32.mrb[6].mxu0 }
 0x1c8   :  { %v987_v28 = vpop.f32.mrb[7].mxu1  ;;  %v276_v29 = vadd.f32 %v275_v26, %v228_v27  ;;  %v981_v30 = vpop.f32.mrb[7].mxu0 }
 0x1cd   :  { %v319_v32 = vpop.f32.mrb[8].mxu0 }
 0x1ce   :  { %v326_v33 = vadd.f32 %v319_v32, %v273_v24  ;;  %v992_v34 = vpop.f32.mrb[9].mxu0 }
 0x1cf   :  { %v322_v35 = vpop.f32.mrb[10].mxu0 }
 0x1d0   :  { %v332_v36 = vadd.f32 %v1280_v31, %v326_v33  ;;  %v327_v37 = vadd.f32 %v322_v35, %v276_v29  ;;  %v993_v38 = vpop.f32.mrb[11].mxu0 }
 0x1d2   :  { %v932_v39 = vpack.c.bf16 %v332_v36, %v332_v36  ;;  %v333_v40 = vadd.f32 %v1280_v31, %v327_v37  ;;  %v388_v49 = vmul.f32 %v1301_v45, %v332_v36 }
 0x1d4   :  { %v933_v41 = vpack.c.bf16 %v333_v40, %v333_v40  ;;  %v334_v42 = vpack.c.bf16 %v333_v40, %v332_v36  ;;  %464 = vst.msk [vmem:[#allocation6] sm:$0xf] %vm463_vm4, %v932_v39  ;;  %v389_v54 = vmul.f32 %v1301_v45, %v333_v40 }
 0x1d6   :  { %995 = vmatpush3.bf16.msra.mxu1 %v334_v42  ;;  %465 = vst.msk [vmem:[#allocation6 + $0x4] sm:$0xf] %vm463_vm4, %v933_v41 }
 0x1d7   :  { %1006 = vmatprep.subr.bf16.mxu1 %v1150_v0 }
 0x1d9   :  { %997 = vmatmul.mubr.msk.bf16.vlgmr.msra.gmra.mrb[8].mxu1 %vm81_vm1, %v1061_v43 }
 0x1da   :  { %1008 = vmatprep.mubr.msk.bf16.mxu1 %vm1151_vm0, %v1150_v0  ;;  %1007 = vmatpush3.bf16.msra.mxu1 %v1062_v58 }
 0x1db   :  { %1018 = vmatprep.subr.bf16.mxu1 %v1150_v0 }
 0x1e1   :  { %1009 = vmatmul.mubr.msk.bf16.vlgmr.msra.gmra.mrb[12].mxu1 %vm81_vm1, %v1064_v59 }
 0x1e2   :  { %1019 = vmatpush3.bf16.msra.mxu1 %v1251_v7  ;;  %1020 = vmatprep.mubr.msk.bf16.mxu1 %vm1151_vm0, %v1150_v0  ;;  %v69_v7 = vld [vmem:[%s1408_s4] sm:$0x1] }
 0x1e3   :  { %1030 = vmatprep.subr.bf16.mxu1 %v1150_v0 }
 0x2ac   :  { %v377_v46 = vpop.f32.mrb[8].mxu1 }
 0x2ad   :  { %v394_v47 = vmul.f32 %v1296_v44, %v377_v46  ;;  %v998_v48 = vpop.f32.mrb[9].mxu1 }
 0x2ae   :  { %v380_v50 = vpop.f32.mrb[10].mxu1  ;;  %v1066_v48 = vld [vmem:[%s1406_s2 + $0x8] sm:$0xff]  }
 0x2af   :  { %v395_v51 = vmul.f32 %v1296_v44, %v380_v50  ;;  %v999_v52 = vpop.f32.mrb[11].mxu1  ;;  %v396_v53 = vadd.f32 %v394_v47, %v388_v49 }
 0x2b1   :  { %v399_v55 = vsel %vm398_vm5, %v396_v53, 0.0  ;;  %v397_v56 = vadd.f32 %v395_v51, %v389_v54 }
 0x2b2   :  { %400 = vadd.xlane.f32.xlu0 %v399_v55 }
 0x2b3   :  { %v402_v57 = vsel %vm398_vm5, %v397_v56, 0.0 }
 0x2b4   :  { %v532_v11 = vpop.f32.mrb[12].mxu1 }
 0x2b5   :  { %v1010_v12 = vpop.f32.mrb[13].mxu1 }
 0x2b6   :  { %403 = vadd.xlane.f32.xlu0 %v402_v57  ;;  %v535_v13 = vpop.f32.mrb[14].mxu1 }
 0x2b7   :  { %v594_v14 = vpack.c.bf16 %v535_v13, %v532_v11  ;;  %v1011_v15 = vpop.f32.mrb[15].mxu1 }
 0x33f   :  { %v401_v61 = vpop.xlane.xlu0 %400 }
 0x340   :  { %v406_v62 = vadd.f32 %v1324_v60, %v401_v61 }
 0x342   :  { %1067 = vtanh.f32 %v406_v62 }
 0x343   :  { %v404_v63 = vpop.xlane.xlu0 %403 }
 0x344   :  { %v407_v1 = vadd.f32 %v1324_v60, %v404_v63 }
 0x346   :  { %1069 = vtanh.f32 %v407_v1 }
 0x34c   :  { %v1068_v2 = vpop.eup %1067 }
 0x34d   :  { %v410_v4 = vmul.f32 %v1068_v2, %v332_v36 }
 0x350   :  { %v1070_v3 = vpop.eup %1069 }
 0x351   :  { %v411_v5 = vmul.f32 %v1070_v3, %v333_v40 }
 0x353   :  { %v412_v6 = vpack.c.bf16 %v411_v5, %v410_v4  ;;  %v917_v5 = vld [vmem:[%s1408_s4 + $0x1] sm:$0x1] }
 0x355   :  { %1001 = vmatpush3.bf16.msra.mxu0 %v412_v6 }
 0x356   :  { %1012 = vmatprep.subr.bf16.mxu0 %v1150_v0 }
 0x358   :  { %1003 = vmatmul.mubr.msk.bf16.vlgmr.msra.gmra.mrb[12].mxu0 %vm81_vm1, %v69_v7 }
 0x359   :  { %1013 = vmatpush3.bf16.msra.mxu0 %v1063_v9  ;;  %1014 = vmatprep.mubr.msk.bf16.mxu0 %vm1151_vm0, %v1150_v0 }
 0x35a   :  { %1024 = vmatprep.subr.bf16.mxu0 %v1150_v0 }
 0x360   :  { %1015 = vmatmul.mubr.msk.bf16.vlgmr.msra.gmra.mrb[16].mxu0 %vm81_vm1, %v1065_v10 }
 0x361   :  { %1025 = vmatpush3.bf16.msra.mxu0 %v1254_v8  ;;  %1026 = vmatprep.mubr.msk.bf16.mxu0 %vm1151_vm0, %v1150_v0 }
 0x362   :  { %1036 = vmatprep.subr.bf16.mxu0 %v1150_v0 }
 0x368   :  { %1027 = vmatmul.mubr.msk.bf16.vlgmr.msra.gmra.mrb[20].mxu0 %vm183_vm3, %v594_v14 }
 0x369   :  { %1038 = vmatprep.mubr.msk.bf16.mxu0 %vm1151_vm0, %v1150_v0 }
 0x42b   :  { %v450_v16 = vpop.f32.mrb[12].mxu0 }
 0x42c   :  { %v466_v17 = vpack.c.bf16 %v450_v16, %v450_v16  ;;  %v1004_v18 = vpop.f32.mrb[13].mxu0 }
 0x42d   :  { %v453_v8 = vpop.f32.mrb[14].mxu0 }
 0x42e   :  { %468 = vst.msk [vmem:[#allocation7] sm:$0x1] %vm467_vm6, %v466_v17  ;;  %v1005_v19 = vpop.f32.mrb[15].mxu0 }
 0x433   :  { %v587_v21 = vpop.f32.mrb[16].mxu0 }
 0x434   :  { %v1016_v22 = vpop.f32.mrb[17].mxu0 }
 0x435   :  { %v590_v23 = vpop.f32.mrb[18].mxu0 }
 0x436   :  { %v595_v24 = vpack.c.bf16 %v590_v23, %v587_v21  ;;  %v1017_v25 = vpop.f32.mrb[19].mxu0 }
 0x438   :  { %1021 = vmatmul.mubr.msk.bf16.vlgmr.msra.gmra.mrb[16].mxu1 %vm183_vm3, %v595_v24 }
 0x439   :  { %1031 = vmatpush3.bf16.msra.mxu1 %v1264_v20  ;;  %1032 = vmatprep.mubr.msk.bf16.mxu1 %vm1151_vm0, %v1150_v0 }
 0x43a   :  { %1042 = vmatprep.subr.bf16.mxu1 %v1150_v0 }
 0x43b   :  { %v677_v26 = vpop.f32.mrb[20].mxu0 }
 0x43c   :  { %v1028_v27 = vpop.f32.mrb[21].mxu0 }
 0x43d   :  { %v680_v28 = vpop.f32.mrb[22].mxu0 }
 0x43e   :  { %v1029_v29 = vpop.f32.mrb[23].mxu0 }
 0x440   :  { %1033 = vmatmul.mubr.msk.bf16.vlgmr.msra.gmra.mrb[20].mxu1 %vm183_vm3, %v1062_v58 }
 0x441   :  { %1044 = vmatprep.mubr.msk.bf16.mxu1 %vm1151_vm0, %v1150_v0 }
 0x50b   :  { %v633_v30 = vpop.f32.mrb[16].mxu1 }
 0x50c   :  { %v678_v32 = vadd.f32 %v677_v26, %v633_v30  ;;  %v1022_v33 = vpop.f32.mrb[17].mxu1 }
 0x50d   :  { %v636_v34 = vpop.f32.mrb[18].mxu1 }
 0x50e   :  { %v681_v35 = vadd.f32 %v680_v28, %v636_v34  ;;  %v1023_v20 = vpop.f32.mrb[19].mxu1 }
 0x513   :  { %v721_v36 = vpop.f32.mrb[20].mxu1 }
 0x514   :  { %v728_v37 = vadd.f32 %v721_v36, %v678_v32  ;;  %v1034_v38 = vpop.f32.mrb[21].mxu1 }
 0x515   :  { %v724_v39 = vpop.f32.mrb[22].mxu1 }
 0x516   :  { %v730_v40 = vadd.f32 %v1280_v31, %v728_v37  ;;  %v729_v41 = vadd.f32 %v724_v39, %v681_v35  ;;  %v1035_v42 = vpop.f32.mrb[23].mxu1 }
 0x518   :  { %v934_v43 = vpack.c.bf16 %v730_v40, %v730_v40  ;;  %v731_v0 = vadd.f32 %v1280_v31, %v729_v41  ;;  %v782_v52 = vmul.f32 %v1301_v45, %v730_v40 }
 0x51a   :  { %v935_v46 = vpack.c.bf16 %v731_v0, %v731_v0  ;;  %v732_v47 = vpack.c.bf16 %v731_v0, %v730_v40  ;;  %852 = vst.msk [vmem:[#allocation6 + $0x8] sm:$0xf] %vm463_vm4, %v934_v43  ;;  %v783_v56 = vmul.f32 %v1301_v45, %v731_v0 }
 0x51c   :  { %1037 = vmatpush3.bf16.msra.mxu0 %v732_v47  ;;  %853 = vst.msk [vmem:[#allocation6 + $0xc] sm:$0xf] %vm463_vm4, %v935_v46 }
 0x51f   :  { %1039 = vmatmul.mubr.msk.bf16.vlgmr.msra.gmra.mrb[24].mxu0 %vm81_vm1, %v1066_v48 }
 0x5f2   :  { %v775_v49 = vpop.f32.mrb[24].mxu0 }
 0x5f3   :  { %v784_v50 = vmul.f32 %v1296_v44, %v775_v49  ;;  %v1040_v51 = vpop.f32.mrb[25].mxu0 }
 0x5f4   :  { %v778_v31 = vpop.f32.mrb[26].mxu0 }
 0x5f5   :  { %v785_v53 = vmul.f32 %v1296_v44, %v778_v31  ;;  %v1041_v54 = vpop.f32.mrb[27].mxu0  ;;  %v786_v55 = vadd.f32 %v784_v50, %v782_v52 }
 0x5f7   :  { %v788_v57 = vsel %vm398_vm5, %v786_v55, 0.0  ;;  %v787_v58 = vadd.f32 %v785_v53, %v783_v56 }
 0x5f8   :  { %789 = vadd.xlane.f32.xlu1 %v788_v57 }
 0x5f9   :  { %v791_v59 = vsel %vm398_vm5, %v787_v58, 0.0 }
 0x5fc   :  { %792 = vadd.xlane.f32.xlu1 %v791_v59 }
 0x685   :  { %v790_v61 = vpop.xlane.xlu1 %789 }
 0x686   :  { %v794_v62 = vadd.f32 %v790_v61, %v1324_v60 }
 0x688   :  { %1071 = vtanh.f32 %v794_v62 }
 0x689   :  { %v793_v63 = vpop.xlane.xlu1 %792 }
 0x68a   :  { %v795_v1 = vadd.f32 %v793_v63, %v1324_v60 }
 0x68c   :  { %1073 = vtanh.f32 %v795_v1 }
 0x692   :  { %v1072_v44 = vpop.eup %1071 }
 0x693   :  { %v798_v3 = vmul.f32 %v1072_v44, %v730_v40 }
 0x696   :  { %v1074_v2 = vpop.eup %1073 }
 0x697   :  { %v799_v4 = vmul.f32 %v1074_v2, %v731_v0 }
 0x699   :  { %v800_v45 = vpack.c.bf16 %v799_v4, %v798_v3 }
 0x69b   :  { %1043 = vmatpush3.bf16.msra.mxu1 %v800_v45 }
 0x69e   :  { %1045 = vmatmul.mubr.msk.bf16.vlgmr.msra.gmra.mrb[24].mxu1 %vm81_vm1, %v917_v5 }
 0x69f   :  { %1108 = shalt.err (!%p1105_p12)
}
 0x6a0   :  { %s1109_s13 = scalar_lea.hbm %s1412_s8, 256 }
 0x6a1   :  { %p1110_p13 = scmp.ne.s32.totalorder %s1412_s8, %s1109_s13  ;;  %p1113_p0 = scmp.lt.u32.totalorder %s1109_s13, %s1412_s8 }
 0x6a3   :  { %p1115_p1 = pnand %p1113_p0, %p1110_p13 }
 0x6a5   :  { %1118 = shalt.err (!%p1115_p1)
}
 0x6a6   :  { %868 = dma.vmem_to_hbm [thread:$0]  %s863_s10, 256, %s1412_s8, [#allocation5], %s1148_s19, %s1148_s19, %s1149_s20  }
 0x6a7   :  { %s1153_s21 = smov [#allocation7]  }
 0x6a8   :  { %s874_s6 = sshll.u32 %s1153_s21, 4  ;;  %s875_s6 = int_to_ptr.vmem [resolvable:$true] %s874_s6 }
 0x6a9   :  { %s1119_s22 = scalar_lea.vmem %s875_s6, 32  ;;  %p1124_p3 = scmp.lt.s32.totalorder %s875_s6, %s875_s6 }
 0x6aa   :  { %p1120_p2 = scmp.ne.s32.totalorder %s875_s6, %s1119_s22  ;;  %p1125_p4 = scmp.lt.s32.totalorder %s1119_s22, %s1119_s22 }
 0x6ac   :  { %p1126_p5 = por %p1125_p4, %p1124_p3 }
 0x6ae   :  { %p1127_p6 = pnand %p1126_p5, %p1120_p2 }
 0x771   :  { %v838_v60 = vpop.f32.mrb[24].mxu1 }
 0x772   :  { %v854_v6 = vpack.c.bf16 %v838_v60, %v838_v60  ;;  %v1046_v7 = vpop.f32.mrb[25].mxu1 }
 0x773   :  { %v841_v9 = vpop.f32.mrb[26].mxu1 }
 0x774   :  { %856 = vst.msk [vmem:[#allocation7 + $0x1] sm:$0x1] %vm467_vm6, %v854_v6  ;;  %v1047_v10 = vpop.f32.mrb[27].mxu1 }
 0x775   :  { %1130 = shalt.err (!%p1127_p6)
}
 0x776   :  { %s1131_s8 = scalar_lea.hbm %s1413_s9, 32 }
 0x777   :  { %p1132_p7 = scmp.ne.s32.totalorder %s1413_s9, %s1131_s8  ;;  %p1135_p8 = scmp.lt.u32.totalorder %s1131_s8, %s1413_s9 }
 0x779   :  { %p1137_p9 = pnand %p1135_p8, %p1132_p7 }
 0x77b   :  { %1140 = shalt.err (!%p1137_p9)
}
 0x77c   :  { %s1154_s1 = smov 16   ;;  %s1155_s26 = smov 1  }
 0x77d   :  { %880 = dma.vmem_to_hbm [thread:$0]  %s875_s6, 32, %s1413_s9, [#allocation8], %s1154_s1, %s1154_s1, %s1155_s26  }
 0x77e   :  { %1143 = dma.done.wait [#allocation5], 256  }
 0x77f   :  { %1144 = vsyncadd [#allocation5], 4294967040 }
 0x780   :  { %1145 = dma.done.wait [#allocation8], 32  }
 0x781   :  { %1146 = vsyncadd [#allocation8], 4294967264 }
 0x782   :  { %887 = vsyncpa [#allocation4], 1 }
 0x783   :  { %888 = vsyncpa [#allocation5], 1 }
 0x784   :  { %889 = vsyncpa [#allocation8], 1 }

</bundles_post_ra>
